<compile_context>
chip_gen: v5e
topology: v5e:2x2
jax: 0.10.0
libtpu: 0.0.40
codegen_flags: <defaults>
</compile_context>

<pallas_src>
import math
import functools

import jax
import jax.numpy as jnp
from jax import lax
from jax.experimental import pallas as pl
from jax.experimental.pallas import tpu as pltpu


def _vmem_capacity_bytes():
    """Per-core VMEM capacity; conservative 64 MiB (v7x) fallback."""
    try:
        return int(pltpu.get_tpu_info().vmem_capacity_bytes)
    except Exception:
        return 64 << 20


def _residency_bytes(tq, seq_len, d, num_heads, itemsize=4):
    """Approximate VMEM residency for one grid step (pipeline double-buffered)."""
    out_blk = num_heads * tq * seq_len * itemsize    # (H, TQ, S) output block
    q_blk = tq * d * itemsize                        # query tile
    k_blk = seq_len * d * itemsize                   # k_proj block (per batch)
    w_blk = (d * d + d) * itemsize                   # Wq^T + bias
    scratch = tq * d * itemsize                      # q_proj scratch (single copy)
    return 2 * (out_blk + q_blk + k_blk + w_blk) + scratch


def _choose_tq(seq_len, d, num_heads, budget_bytes=None):
    """Largest legal query tile whose double-buffered residency fits VMEM."""
    if budget_bytes is None:
        budget_bytes = int(0.7 * _vmem_capacity_bytes())
    # Legal tiles: divisors of S that are multiples of 8, plus the full dim.
    cands = [t for t in range(8, seq_len, 8) if seq_len % t == 0]
    cands.append(seq_len)
    fitting = [t for t in cands
               if _residency_bytes(t, seq_len, d, num_heads) <= budget_bytes]
    if fitting:
        return max(fitting)
    # Nothing fits the budget: clamp to the smallest legal tile (never silently
    # fall back to TQ == S) and let the explicit vmem_limit cover the rest.
    return min(cands)


def _mha_gcn_kernel(q_ref, kproj_ref, wqt_ref, bq_ref, o_ref, qproj_ref, *,
                    num_heads, d_k, mxu_dtype):
    # q_ref:     (TQ, D) query tile for this grid step
    # kproj_ref: (S, D)  precomputed key projection for this batch
    # wqt_ref:   (D, D)  pre-transposed Wq with 1/sqrt(d_k) folded in
    # bq_ref:    (1, D)  scaled bias
    # o_ref:     (H, TQ, S)
    # qproj_ref: VMEM scratch (TQ, D)

    # Fused query projection for this tile (scale already folded into wqt/bq).
    q_in = q_ref[...]
    w_in = wqt_ref[...]
    if mxu_dtype is not None:
        q_in = q_in.astype(mxu_dtype)
        w_in = w_in.astype(mxu_dtype)
    qproj_ref[...] = (jnp.dot(q_in, w_in, preferred_element_type=jnp.float32)
                      + bq_ref[0, :])

    # Per-head scores + softmax.  Slicing refs (not live values) keeps only one
    # head's operands live per iteration; softmax math stays in f32 (VPU/EUP).
    for h in range(num_heads):
        qh = qproj_ref[:, h * d_k:(h + 1) * d_k]      # (TQ, d_k)
        kh = kproj_ref[:, h * d_k:(h + 1) * d_k]      # (S,  d_k)
        if mxu_dtype is not None:
            qh = qh.astype(mxu_dtype)
            kh = kh.astype(mxu_dtype)
        # scores = qh @ kh^T via dot_general contracting the last dims (MXU
        # trans_b form, no explicit transpose / VMEM copy).
        scores = lax.dot_general(qh, kh, (((1,), (1,)), ((), ())),
                                 preferred_element_type=jnp.float32)  # (TQ, S)
        m = jnp.max(scores, axis=-1, keepdims=True)
        e = jnp.exp(scores - m)
        # Exact reciprocal: the kernel is HBM-write-bound, so this is free and
        # keeps softmax rows summing to 1 (approx=True broke the 1e-4 check).
        p = e / jnp.sum(e, axis=-1, keepdims=True)
        o_ref[h] = p.astype(o_ref.dtype)


def multi_head_attention_gcn(query, key, wq, bq, wk, bk, num_heads, *,
                             tq=None, mxu_dtype=None):
    """query/key: (B, S, D); wq/wk: (D, D); bq/bk: (D,). Returns (B, H, S, S)."""
    B, S, D = query.shape
    assert D % num_heads == 0
    d_k = D // num_heads
    scale = 1.0 / math.sqrt(d_k)

    # nn.Linear computes x @ W^T: pre-transpose Wq once (HBM/XLA side) and fold
    # the 1/sqrt(d_k) score scale into the query projection.
    wqt = (wq * scale).T.astype(jnp.float32)
    bqs = (bq * scale).reshape(1, D).astype(jnp.float32)

    # Key projection hoisted out of the kernel: computed once per call on the
    # XLA side (extra HBM traffic is negligible vs. the B*H*S*S output) and
    # streamed into the kernel as a (B, S, D) input.
    k_proj = (key.astype(jnp.float32) @ wk.T.astype(jnp.float32)
              + bk.astype(jnp.float32))

    if tq is None:
        tq = _choose_tq(S, D, num_heads)
    assert S % tq == 0 and (tq == S or tq % 8 == 0)

    vmem_need = _residency_bytes(tq, S, D, num_heads)
    vmem_limit = int(min(0.9 * _vmem_capacity_bytes(),
                         max(vmem_need * 5 // 4, 32 << 20)))

    kernel = functools.partial(_mha_gcn_kernel, num_heads=num_heads, d_k=d_k,
                               mxu_dtype=mxu_dtype)

    return pl.pallas_call(
        kernel,
        out_shape=jax.ShapeDtypeStruct((B, num_heads, S, S), jnp.float32),
        grid_spec=pltpu.PrefetchScalarGridSpec(
            num_scalar_prefetch=0,
            grid=(B, S // tq),
            in_specs=[
                pl.BlockSpec((None, tq, D), lambda b, q: (b, q, 0)),   # query tile
                pl.BlockSpec((None, S, D), lambda b, q: (b, 0, 0)),    # k_proj (batch)
                pl.BlockSpec((D, D), lambda b, q: (0, 0)),             # Wq^T * scale
                pl.BlockSpec((1, D), lambda b, q: (0, 0)),             # bq * scale
            ],
            out_specs=pl.BlockSpec((None, num_heads, tq, S),
                                   lambda b, q: (b, 0, q, 0)),
            scratch_shapes=[pltpu.VMEM((tq, D), jnp.float32)],         # q_proj
        ),
        compiler_params=pltpu.CompilerParams(
            # No cross-iteration carry remains -> both axes parallel (megacore).
            dimension_semantics=("parallel", "parallel"),
            vmem_limit_bytes=vmem_limit),
    )(query.astype(jnp.float32), k_proj, wqt, bqs)


def _reference(query, key, wq, bq, wk, bk, num_heads):
    B, S, D = query.shape
    d_k = D // num_heads
    qp = query @ wq.T + bq
    kp = key @ wk.T + bk
    qh = qp.reshape(B, S, num_heads, d_k).transpose(0, 2, 1, 3)
    kh = kp.reshape(B, S, num_heads, d_k).transpose(0, 2, 1, 3)
    scores = jnp.einsum("bhqd,bhkd->bhqk", qh, kh) / math.sqrt(d_k)
    return jax.nn.softmax(scores, axis=-1)


if __name__ == "__main__":
    # Small shapes consistent with the module: d divisible by h.
    B, S, D, H = 2, 8, 32, 4

    key0 = jax.random.PRNGKey(0)
    k_q, k_k, k_wq, k_bq, k_wk, k_bk = jax.random.split(key0, 6)

    query = jax.random.normal(k_q, (B, S, D), dtype=jnp.float32)
    key_in = jax.random.normal(k_k, (B, S, D), dtype=jnp.float32)

    # Deterministic nn.Linear(d, d) parameters (uniform like torch default).
    bound = 1.0 / math.sqrt(D)
    wq = jax.random.uniform(k_wq, (D, D), minval=-bound, maxval=bound, dtype=jnp.float32)
    bq = jax.random.uniform(k_bq, (D,), minval=-bound, maxval=bound, dtype=jnp.float32)
    wk = jax.random.uniform(k_wk, (D, D), minval=-bound, maxval=bound, dtype=jnp.float32)
    bk = jax.random.uniform(k_bk, (D,), minval=-bound, maxval=bound, dtype=jnp.float32)

    attn = multi_head_attention_gcn(query, key_in, wq, bq, wk, bk, H)
    attn = jax.block_until_ready(attn)

    ref = _reference(query, key_in, wq, bq, wk, bk, H)
    assert attn.shape == (B, H, S, S)
    assert jnp.allclose(attn, ref, atol=1e-4, rtol=1e-4)

    print("KERNEL_OK")
</pallas_src>

<mosaic_0001>
module attributes {stable_mosaic.version = 11 : i64} {
  func.func @_mha_gcn_kernel(%arg0: i32, %arg1: i32, %arg2: memref<1x8x32xf32, #tpu.memory_space<vmem>>, %arg3: memref<1x8x32xf32, #tpu.memory_space<vmem>>, %arg4: memref<32x32xf32, #tpu.memory_space<vmem>>, %arg5: memref<1x32xf32, #tpu.memory_space<vmem>>, %arg6: memref<1x4x8x8xf32, #tpu.memory_space<vmem>>, %arg7: memref<8x32xf32, #tpu.memory_space<vmem>>) attributes {dimension_semantics = [#tpu.dimension_semantics<parallel>, #tpu.dimension_semantics<parallel>], iteration_bounds = array<i64: 2, 1>, scalar_prefetch = 0 : i64, scratch_operands = 1 : i64, tpu.core_type = #tpu.core_type<tc>, window_params = [{transform_indices = @transform_0, window_bounds = array<i64: 1, 8, 32>}, {transform_indices = @transform_1, window_bounds = array<i64: 1, 8, 32>}, {pipeline_mode = #tpu.pipeline_mode<synchronous>, transform_indices = @transform_2, window_bounds = array<i64: 32, 32>}, {pipeline_mode = #tpu.pipeline_mode<synchronous>, transform_indices = @transform_3, window_bounds = array<i64: 1, 32>}, {transform_indices = @transform_4, window_bounds = array<i64: 1, 4, 8, 8>}]} {
    %c0 = arith.constant 0 : index
    %c0_0 = arith.constant 0 : index
    %c0_1 = arith.constant 0 : index
    %0 = vector.load %arg2[%c0, %c0_0, %c0_1] : memref<1x8x32xf32, #tpu.memory_space<vmem>>, vector<1x8x32xf32>
    %1 = vector.shape_cast %0 : vector<1x8x32xf32> to vector<8x32xf32>
    %c0_2 = arith.constant 0 : index
    %c0_3 = arith.constant 0 : index
    %2 = vector.load %arg4[%c0_2, %c0_3] : memref<32x32xf32, #tpu.memory_space<vmem>>, vector<32x32xf32>
    %cst = arith.constant dense<0.000000e+00> : vector<8x32xf32>
    %3 = tpu.matmul %1, %2, %cst {dimension_numbers = #tpu.dot_dimension_numbers<[1], [0], [0], [1], [0, 0, 1, 1], [], []>} : vector<8x32xf32>, vector<32x32xf32>, vector<8x32xf32> -> vector<8x32xf32>
    %c0_4 = arith.constant 0 : index
    %c0_5 = arith.constant 0 : index
    %4 = vector.load %arg5[%c0_4, %c0_5] : memref<1x32xf32, #tpu.memory_space<vmem>>, vector<1x32xf32>
    %5 = vector.shape_cast %4 : vector<1x32xf32> to vector<32xf32>
    %6 = vector.shape_cast %5 : vector<32xf32> to vector<1x32xf32>
    %7 = vector.broadcast %6 : vector<1x32xf32> to vector<8x32xf32>
    %8 = arith.addf %3, %7 : vector<8x32xf32>
    %c0_6 = arith.constant 0 : index
    %c0_7 = arith.constant 0 : index
    %9 = vector.load %arg7[%c0_6, %c0_7] : memref<8x32xf32, #tpu.memory_space<vmem>>, vector<8x32xf32>
    tpu.vector_store %arg7[%c0_6, %c0_7], %8 {strides = array<i32>} : memref<8x32xf32, #tpu.memory_space<vmem>>, vector<8x32xf32>,
    %c0_8 = arith.constant 0 : index
    %c0_9 = arith.constant 0 : index
    %10 = vector.load %arg7[%c0_8, %c0_9] : memref<8x32xf32, #tpu.memory_space<vmem>>, vector<8x8xf32>
    %c0_10 = arith.constant 0 : index
    %c0_11 = arith.constant 0 : index
    %c0_12 = arith.constant 0 : index
    %11 = vector.load %arg3[%c0_10, %c0_11, %c0_12] : memref<1x8x32xf32, #tpu.memory_space<vmem>>, vector<1x8x8xf32>
    %12 = vector.shape_cast %11 : vector<1x8x8xf32> to vector<8x8xf32>
    %cst_13 = arith.constant dense<0.000000e+00> : vector<8x8xf32>
    %13 = tpu.matmul %10, %12, %cst_13 {dimension_numbers = #tpu.dot_dimension_numbers<[1], [1], [0], [0], [0, 0, 1, 0], [], []>} : vector<8x8xf32>, vector<8x8xf32>, vector<8x8xf32> -> vector<8x8xf32>
    %cst_14 = arith.constant dense<0xFF800000> : vector<8xf32>
    %14 = vector.multi_reduction <maximumf>, %13, %cst_14 [1] : vector<8x8xf32> to vector<8xf32>
    %15 = vector.shape_cast %14 : vector<8xf32> to vector<8x1xf32>
    %16 = vector.broadcast %15 : vector<8x1xf32> to vector<8x8xf32>
    %17 = arith.subf %13, %16 : vector<8x8xf32>
    %18 = math.exp %17 : vector<8x8xf32>
    %cst_15 = arith.constant dense<0.000000e+00> : vector<8xf32>
    %19 = vector.multi_reduction <add>, %18, %cst_15 [1] : vector<8x8xf32> to vector<8xf32>
    %20 = vector.shape_cast %19 : vector<8xf32> to vector<8x1xf32>
    %21 = vector.broadcast %20 : vector<8x1xf32> to vector<8x8xf32>
    %22 = arith.divf %18, %21 : vector<8x8xf32>
    %c0_16 = arith.constant 0 : index
    %c0_17 = arith.constant 0 : index
    %c0_18 = arith.constant 0 : index
    %c0_19 = arith.constant 0 : index
    %23 = vector.load %arg6[%c0_16, %c0_17, %c0_18, %c0_19] : memref<1x4x8x8xf32, #tpu.memory_space<vmem>>, vector<1x1x8x8xf32>
    %24 = vector.shape_cast %23 : vector<1x1x8x8xf32> to vector<8x8xf32>
    %25 = vector.shape_cast %22 : vector<8x8xf32> to vector<1x1x8x8xf32>
    tpu.vector_store %arg6[%c0_16, %c0_17, %c0_18, %c0_19], %25 {strides = array<i32>} : memref<1x4x8x8xf32, #tpu.memory_space<vmem>>, vector<1x1x8x8xf32>,
    %c0_20 = arith.constant 0 : index
    %c8 = arith.constant 8 : index
    %26 = vector.load %arg7[%c0_20, %c8] : memref<8x32xf32, #tpu.memory_space<vmem>>, vector<8x8xf32>
    %c0_21 = arith.constant 0 : index
    %c0_22 = arith.constant 0 : index
    %c8_23 = arith.constant 8 : index
    %27 = vector.load %arg3[%c0_21, %c0_22, %c8_23] : memref<1x8x32xf32, #tpu.memory_space<vmem>>, vector<1x8x8xf32>
    %28 = vector.shape_cast %27 : vector<1x8x8xf32> to vector<8x8xf32>
    %cst_24 = arith.constant dense<0.000000e+00> : vector<8x8xf32>
    %29 = tpu.matmul %26, %28, %cst_24 {dimension_numbers = #tpu.dot_dimension_numbers<[1], [1], [0], [0], [0, 0, 1, 0], [], []>} : vector<8x8xf32>, vector<8x8xf32>, vector<8x8xf32> -> vector<8x8xf32>
    %cst_25 = arith.constant dense<0xFF800000> : vector<8xf32>
    %30 = vector.multi_reduction <maximumf>, %29, %cst_25 [1] : vector<8x8xf32> to vector<8xf32>
    %31 = vector.shape_cast %30 : vector<8xf32> to vector<8x1xf32>
    %32 = vector.broadcast %31 : vector<8x1xf32> to vector<8x8xf32>
    %33 = arith.subf %29, %32 : vector<8x8xf32>
    %34 = math.exp %33 : vector<8x8xf32>
    %cst_26 = arith.constant dense<0.000000e+00> : vector<8xf32>
    %35 = vector.multi_reduction <add>, %34, %cst_26 [1] : vector<8x8xf32> to vector<8xf32>
    %36 = vector.shape_cast %35 : vector<8xf32> to vector<8x1xf32>
    %37 = vector.broadcast %36 : vector<8x1xf32> to vector<8x8xf32>
    %38 = arith.divf %34, %37 : vector<8x8xf32>
    %c0_27 = arith.constant 0 : index
    %c1 = arith.constant 1 : index
    %c0_28 = arith.constant 0 : index
    %c0_29 = arith.constant 0 : index
    %39 = vector.load %arg6[%c0_27, %c1, %c0_28, %c0_29] : memref<1x4x8x8xf32, #tpu.memory_space<vmem>>, vector<1x1x8x8xf32>
    %40 = vector.shape_cast %39 : vector<1x1x8x8xf32> to vector<8x8xf32>
    %41 = vector.shape_cast %38 : vector<8x8xf32> to vector<1x1x8x8xf32>
    tpu.vector_store %arg6[%c0_27, %c1, %c0_28, %c0_29], %41 {strides = array<i32>} : memref<1x4x8x8xf32, #tpu.memory_space<vmem>>, vector<1x1x8x8xf32>,
    %c0_30 = arith.constant 0 : index
    %c16 = arith.constant 16 : index
    %42 = vector.load %arg7[%c0_30, %c16] : memref<8x32xf32, #tpu.memory_space<vmem>>, vector<8x8xf32>
    %c0_31 = arith.constant 0 : index
    %c0_32 = arith.constant 0 : index
    %c16_33 = arith.constant 16 : index
    %43 = vector.load %arg3[%c0_31, %c0_32, %c16_33] : memref<1x8x32xf32, #tpu.memory_space<vmem>>, vector<1x8x8xf32>
    %44 = vector.shape_cast %43 : vector<1x8x8xf32> to vector<8x8xf32>
    %cst_34 = arith.constant dense<0.000000e+00> : vector<8x8xf32>
    %45 = tpu.matmul %42, %44, %cst_34 {dimension_numbers = #tpu.dot_dimension_numbers<[1], [1], [0], [0], [0, 0, 1, 0], [], []>} : vector<8x8xf32>, vector<8x8xf32>, vector<8x8xf32> -> vector<8x8xf32>
    %cst_35 = arith.constant dense<0xFF800000> : vector<8xf32>
    %46 = vector.multi_reduction <maximumf>, %45, %cst_35 [1] : vector<8x8xf32> to vector<8xf32>
    %47 = vector.shape_cast %46 : vector<8xf32> to vector<8x1xf32>
    %48 = vector.broadcast %47 : vector<8x1xf32> to vector<8x8xf32>
    %49 = arith.subf %45, %48 : vector<8x8xf32>
    %50 = math.exp %49 : vector<8x8xf32>
    %cst_36 = arith.constant dense<0.000000e+00> : vector<8xf32>
    %51 = vector.multi_reduction <add>, %50, %cst_36 [1] : vector<8x8xf32> to vector<8xf32>
    %52 = vector.shape_cast %51 : vector<8xf32> to vector<8x1xf32>
    %53 = vector.broadcast %52 : vector<8x1xf32> to vector<8x8xf32>
    %54 = arith.divf %50, %53 : vector<8x8xf32>
    %c0_37 = arith.constant 0 : index
    %c2 = arith.constant 2 : index
    %c0_38 = arith.constant 0 : index
    %c0_39 = arith.constant 0 : index
    %55 = vector.load %arg6[%c0_37, %c2, %c0_38, %c0_39] : memref<1x4x8x8xf32, #tpu.memory_space<vmem>>, vector<1x1x8x8xf32>
    %56 = vector.shape_cast %55 : vector<1x1x8x8xf32> to vector<8x8xf32>
    %57 = vector.shape_cast %54 : vector<8x8xf32> to vector<1x1x8x8xf32>
    tpu.vector_store %arg6[%c0_37, %c2, %c0_38, %c0_39], %57 {strides = array<i32>} : memref<1x4x8x8xf32, #tpu.memory_space<vmem>>, vector<1x1x8x8xf32>,
    %c0_40 = arith.constant 0 : index
    %c24 = arith.constant 24 : index
    %58 = vector.load %arg7[%c0_40, %c24] : memref<8x32xf32, #tpu.memory_space<vmem>>, vector<8x8xf32>
    %c0_41 = arith.constant 0 : index
    %c0_42 = arith.constant 0 : index
    %c24_43 = arith.constant 24 : index
    %59 = vector.load %arg3[%c0_41, %c0_42, %c24_43] : memref<1x8x32xf32, #tpu.memory_space<vmem>>, vector<1x8x8xf32>
    %60 = vector.shape_cast %59 : vector<1x8x8xf32> to vector<8x8xf32>
    %cst_44 = arith.constant dense<0.000000e+00> : vector<8x8xf32>
    %61 = tpu.matmul %58, %60, %cst_44 {dimension_numbers = #tpu.dot_dimension_numbers<[1], [1], [0], [0], [0, 0, 1, 0], [], []>} : vector<8x8xf32>, vector<8x8xf32>, vector<8x8xf32> -> vector<8x8xf32>
    %cst_45 = arith.constant dense<0xFF800000> : vector<8xf32>
    %62 = vector.multi_reduction <maximumf>, %61, %cst_45 [1] : vector<8x8xf32> to vector<8xf32>
    %63 = vector.shape_cast %62 : vector<8xf32> to vector<8x1xf32>
    %64 = vector.broadcast %63 : vector<8x1xf32> to vector<8x8xf32>
    %65 = arith.subf %61, %64 : vector<8x8xf32>
    %66 = math.exp %65 : vector<8x8xf32>
    %cst_46 = arith.constant dense<0.000000e+00> : vector<8xf32>
    %67 = vector.multi_reduction <add>, %66, %cst_46 [1] : vector<8x8xf32> to vector<8xf32>
    %68 = vector.shape_cast %67 : vector<8xf32> to vector<8x1xf32>
    %69 = vector.broadcast %68 : vector<8x1xf32> to vector<8x8xf32>
    %70 = arith.divf %66, %69 : vector<8x8xf32>
    %c0_47 = arith.constant 0 : index
    %c3 = arith.constant 3 : index
    %c0_48 = arith.constant 0 : index
    %c0_49 = arith.constant 0 : index
    %71 = vector.load %arg6[%c0_47, %c3, %c0_48, %c0_49] : memref<1x4x8x8xf32, #tpu.memory_space<vmem>>, vector<1x1x8x8xf32>
    %72 = vector.shape_cast %71 : vector<1x1x8x8xf32> to vector<8x8xf32>
    %73 = vector.shape_cast %70 : vector<8x8xf32> to vector<1x1x8x8xf32>
    tpu.vector_store %arg6[%c0_47, %c3, %c0_48, %c0_49], %73 {strides = array<i32>} : memref<1x4x8x8xf32, #tpu.memory_space<vmem>>, vector<1x1x8x8xf32>,
    return
  }
  func.func @transform_0(%arg0: i32, %arg1: i32) -> (i32, i32, i32) {
    %c0_i32 = arith.constant 0 : i32
    %c0_i32_0 = arith.constant 0 : i32
    return %arg0, %arg1, %c0_i32 : i32, i32, i32
  }
  func.func @transform_1(%arg0: i32, %arg1: i32) -> (i32, i32, i32) {
    %c0_i32 = arith.constant 0 : i32
    %c0_i32_0 = arith.constant 0 : i32
    %c0_i32_1 = arith.constant 0 : i32
    return %arg0, %c0_i32, %c0_i32_0 : i32, i32, i32
  }
  func.func @transform_2(%arg0: i32, %arg1: i32) -> (i32, i32) {
    %c0_i32 = arith.constant 0 : i32
    %c0_i32_0 = arith.constant 0 : i32
    %c0_i32_1 = arith.constant 0 : i32
    return %c0_i32, %c0_i32_0 : i32, i32
  }
  func.func @transform_3(%arg0: i32, %arg1: i32) -> (i32, i32) {
    %c0_i32 = arith.constant 0 : i32
    %c0_i32_0 = arith.constant 0 : i32
    %c0_i32_1 = arith.constant 0 : i32
    return %c0_i32, %c0_i32_0 : i32, i32
  }
  func.func @transform_4(%arg0: i32, %arg1: i32) -> (i32, i32, i32, i32) {
    %c0_i32 = arith.constant 0 : i32
    %c0_i32_0 = arith.constant 0 : i32
    %c0_i32_1 = arith.constant 0 : i32
    return %arg0, %c0_i32, %arg1, %c0_i32_0 : i32, i32, i32, i32
  }
}

</mosaic_0001>

<bundles_post_ra>
// kernel: tpu_custom_call.1
= control target key start
LH: loop header
LB: loop body
LE: loop exit
PB: predicated region body
PF: predicated region fallthrough
CT: control target
= control target key end

     0   :  { %s1218_s0 = inlined_call_operand.hbm [shape: f32[2,8,32], index: 0, kind: input, shape index: {}]   ;;  %s1219_s1 = inlined_call_operand.hbm [shape: f32[2,8,32], index: 1, kind: input, shape index: {}]   ;;  %s1220_s2 = inlined_call_operand.hbm [shape: f32[32,32], index: 2, kind: input, shape index: {}]   ;;  %s1221_s3 = inlined_call_operand.vmem [shape: f32[1,32], index: 3, kind: input, shape index: {}]   ;;  %s1222_s4 = inlined_call_operand.hbm [shape: f32[2,4,8,8], index: 4, kind: output, shape index: {}]  }
   0x1   :  { %1226 = sst [smem:[#allocation18_spill]] %s1220_s2 }
   0x2   :  { %9 = vsyncpa [#allocation4], 0 }
   0x3   :  { %11 = vsyncpa [#allocation4 + $0x1], 0 }
   0x4   :  { %12 = vsyncpa [#allocation7], 0 }
   0x5   :  { %14 = vsyncpa [#allocation7 + $0x1], 0 }
   0x6   :  { %15 = vsyncpa [#allocation5], 0 }
   0x7   :  { %17 = vsyncpa [#allocation5 + $0x1], 0  ;;  %s1031_s15 = smov 0   ;;  %s1033_s16 = smov 0  }
   0x8   :  { %s1035_s17 = smov 0   ;;  %s1037_s18 = smov 0  }
   0x9   :  { %s1039_s19 = smov 0   ;;  %s1041_s20 = smov 0  }
   0xa LB: > { %1227 = sst [smem:[#allocation14_spill]] %s984_s17  ;;  %s1062_s21 = sadd.s32 4294967295, %s996_s20   ;;  %s996_s20 = sphi %s1041_s20, %s23_s20   ;;  %s992_s19 = sphi %s1039_s19, %s1240_s19   ;;  %s988_s18 = sphi %s1037_s18, %s1239_s18   ;;  %s984_s17 = sphi %s1035_s17, %s1238_s17   ;;  %s980_s16 = sphi %s1033_s16, %s1242_s16   ;;  %s976_s15 = sphi %s1031_s15, %s1241_s15  }
   0xb   : > { %1228 = sst [smem:[#allocation15_spill]] %s992_s19  ;;  %p684_p0 = scmp.ge.s32.totalorder %s996_s20, 1 }
   0xc   : > { %p58_p1 = scmp.eq.s32.totalorder %s1062_s21, 0  ;;  %p164_p2 = scmp.lt.s32.totalorder %s996_s20, 3 }
   0xd   : > { %s1229_s2 = sld [smem:[#allocation18_spill]]  ;;  %s998_s26 = smov [#allocation8]  }
   0xe   : > { %p1070_p3 = pnand %p684_p0, %p164_p2  ;;  %s177_s27 = sshll.u32 %s998_s26, 4  ;;  %s178_s27 = int_to_ptr.vmem [resolvable:$true] %s177_s27 }
   0xf   : > { %p686_p6 = scmp.ge.s32.totalorder %s996_s20, 2  ;;  %s999_s28 = smov 128  }
  0x10   : > { %p724_p4 = pneg %p1070_p3  ;;  %s1000_s29 = smov 8  }
  0x11   : > { %s683_s30 = sadd.s32 4294967294, %s996_s20   ;;  %s35_s5 = sadd.s32 1, %s992_s19 }
  0x12   : > { %p725_p5 = pnand %p724_p4, %p58_p1  ;;  %s44_s6 = sadd.s32 1, %s984_s17 }
  0x13   : > { %s175_s24 = sshll.u32 %s1229_s2, 4  ;;  %p37_p7 = scmp.ge.s32.totalorder %s35_s5, 2  ;;  %s176_s24 = int_to_ptr.hbm [resolvable:$true] %s175_s24 }
  0x14   : > { %727 = dma.hbm_to_vmem [thread:$0]  (!%p725_p5), %s176_s24, 512, %s178_s27, [#allocation7], %s999_s28, %s999_s28, %s1000_s29  }
  0x15   : > { %p51_p8 = scmp.ne.s32.totalorder %s984_s17, %s980_s16  ;;  %p52_p9 = scmp.eq.s32.totalorder %s996_s20, 0 }
  0x16   : > { %p57_p10 = scmp.ne.s32.totalorder %s980_s16, %s976_s15  ;;  %s1244_s5 = smov (%p37_p7, %s35_s5), 0 }
  0x17   : > { %1231 = sst [smem:[#allocation16_spill]] %s1244_s5  ;;  %p1089_p11 = por %p52_p9, %p51_p8 }
  0x18   : > { %p1095_p12 = por %p58_p1, %p57_p10  ;;  %s39_s9 = ssub.s32 %s992_s19, %s1244_s5 }
  0x19   : > { %p151_p13 = scmp.eq.s32.totalorder %s1062_s21, 1  ;;  %p42_p0 = scmp.eq.s32.totalorder %s39_s9, 0 }
  0x1a   : > { %p157_p2 = scmp.eq.s32.totalorder %s683_s30, 1  ;;  %p740_p5 = scmp.lt.s32.totalorder %s996_s20, 2 }
  0x1b   : > { %p1102_p4 = por %p151_p13, %p51_p8  ;;  %s194_s13 = sand.u32 1, %s984_s17  }
  0x1c   : > { %s1108_s11 = scalar_select %p42_p0, %s984_s17, %s44_s6  }
  0x1d   : > { %p1110_p7 = por %p157_p2, %p57_p10  ;;  %s687_s14 = sshll.u32 %s194_s13, 3 }
  0x1e   : > { %1235 = sst [smem:[#allocation17_spill]] %s1108_s11  ;;  %s688_s22 = sshll.u32 %s992_s19, 3 }
  0x1f   : > { %s203_s26 = scalar_lea.hbm %s1218_s0, %s688_s22  ;;  %s198_s27 = scalar_lea.vmem [#allocation3], %s687_s14 }
  0x20   : > { %s207_s28 = sshll.u32 %s198_s27, 4  ;;  %s205_s29 = sshll.u32 %s203_s26, 4  ;;  %s208_s28 = int_to_ptr.vmem [resolvable:$true] %s207_s28  ;;  %s206_s29 = int_to_ptr.hbm [resolvable:$true] %s205_s29 }
  0x21   : > { %p729_p8 = pnand %p740_p5, %p1089_p11  ;;  %s222_s9 = scalar_lea.hbm %s1219_s1, %s688_s22 }
  0x22   : > { %s214_s2 = sand.u32 1, %s996_s20   ;;  %s195_s5 = scalar_lea.sflag [#allocation4], %s194_s13 }
  0x23   : > { %731 = dma.hbm_to_vmem [thread:$0]  (!%p729_p8), %s206_s29, 128, %s208_s28, %s195_s5  }
  0x24   : > { %s224_s11 = sshll.u32 %s222_s9, 4  ;;  %s218_s19 = scalar_lea.vmem [#allocation6], %s687_s14  ;;  %s225_s11 = int_to_ptr.hbm [resolvable:$true] %s224_s11 }
  0x25   : > { %s226_s17 = sshll.u32 %s218_s19, 4  ;;  %s215_s23 = scalar_lea.sflag [#allocation7], %s214_s2  ;;  %s227_s17 = int_to_ptr.vmem [resolvable:$true] %s226_s17 }
  0x26   : > { %734 = dma.hbm_to_vmem [thread:$0]  (!%p729_p8), %s225_s11, 128, %s227_s17, %s215_s23  }
  0x27   : > { %235 = sbr.rel (%p1070_p3) target bundleno = 725 (0x2d5), region = 36  ;;  %s1128_s7 = sand.u32 (!%p1070_p3), 1, %s980_s16  }
  0x28   : > { %s692_s22 = sshll.u32 (!%p1070_p3), %s1128_s7, 3  ;;  %s238_s24 = scalar_lea.sflag (!%p1070_p3), [#allocation4], %s1128_s7 }
  0x29   : > { %s241_s13 = scalar_lea.vmem (!%p1070_p3), [#allocation3], %s692_s22 }
  0x2c   : > { %959 = dma.done.wait (%p1095_p12), %s238_s24, 128  }
  0x2d   : > { %961 = vsyncadd (%p1095_p12), %s238_s24, 4294967168  ;;  %s247_s2 = sand.u32 1, %s1062_s21   ;;  %s251_s19 = scalar_lea.vmem [#allocation6], %s692_s22 }
  0x2e   : > { %s248_s17 = scalar_lea.sflag [#allocation7], %s247_s2 }
  0x2f   : > { %963 = dma.done.wait (%p1095_p12), %s248_s17, 128  }
  0x30   : > { %965 = vsyncadd (%p1095_p12), %s248_s17, 4294967168 }
  0x31   : > { %967 = dma.done.wait (%p58_p1), [#allocation7], 512  }
  0x32   : > { %969 = vsyncadd (%p58_p1), [#allocation7], 4294966784  ;;  %v291_v0 = vld [vmem:[#allocation8 + $0x18] sm:$0xff]  ;;  %v290_v1 = vld [vmem:[#allocation8 + $0x10] sm:$0xff]  ;;  %vm296_vm0 = vcmask 261120   ;;  %s1001_s25 = smov 104  }
  0x33   : > { %312 = vmatpush.msra.mxu0 %v291_v0  ;;  %v289_v2 = vld [vmem:[#allocation8 + $0x8] sm:$0xff]  ;;  %v288_v3 = vld [vmem:[#allocation8] sm:$0xff]  ;;  %v492_v5 = vld [vmem:[%s251_s19] sm:$0xff]  ;;  %s1002_s5 = smov 120   ;;  %vm323_vm1 = vcmask 64512   ;;  %s1003_s21 = smov 112  }
  0x34   : > { %v287_v4 = vld [vmem:[%s241_s13] sm:$0xff]  ;;  %497 = vrot.lane.b32.xlu2 %v492_v5, %s1001_s25  ;;  %381 = vrot.lane.b32.xlu0 %v492_v5, %s1002_s5  ;;  %v799_v6 = vld [vmem:[%s1221_s3] ss:$0 sm:$0xff]  ;;  %s695_s14 = sshll.u32 %s1128_s7, 5  ;;  %s713_s27 = sshll.u32 %s988_s18, 5 }
  0x35   : > { %313 = vmatpush.msra.mxu0 %v290_v1  ;;  %697 = vmatpush.xpose.msk.msra.mxu1 %vm323_vm1, %v492_v5  ;;  %s1166_s26 = scalar_lea.vmem [#allocation9], %s695_s14  ;;  %s562_s30 = scalar_lea.hbm %s1222_s4, %s713_s27 }
  0x36   : > { %s563_s18 = sshll.u32 %s1166_s26, 4  ;;  %s565_s6 = sshll.u32 %s562_s30, 4  ;;  %s564_s18 = int_to_ptr.vmem [resolvable:$true] %s563_s18  ;;  %s566_s6 = int_to_ptr.hbm [resolvable:$true] %s565_s6 }
  0x37   : > { %314 = vmatpush.msra.mxu0 %v289_v2  ;;  %s550_s9 = scalar_lea.sflag [#allocation5], %s1128_s7  ;;  %s920_s23 = sshra.s32 %s566_s6, 4  ;;  %s921_s23 = int_to_ptr.hbm [resolvable:$true] %s920_s23 }
  0x38   : > { %s922_s22 = scalar_lea.hbm %s921_s23, 32  ;;  %s926_s2 = scalar_lea.hbm %s1222_s4, 64 }
  0x39   : > { %315 = vmatpush.msra.mxu0 %v288_v3  ;;  %p923_p1 = scmp.ne.s32.totalorder %s921_s23, %s922_s22  ;;  %p927_p10 = scmp.lt.s32.totalorder %s921_s23, %s1222_s4 }
  0x3a   : > { %696 = vmatmul.msk.f32.vlgmr.msra.gmra.mxu0 %vm296_vm0, %v287_v4  ;;  %p928_p11 = scmp.lt.s32.totalorder %s926_s2, %s922_s22 }
  0x3b   : > { %p924_p3 = pnand %p923_p1, %p1102_p4 }
  0x3c   : > { %439 = vrot.lane.b32.xlu0 %v492_v5, %s1003_s21  ;;  %p929_p12 = por %p928_p11, %p927_p10 }
  0x3d   : > { %p925_p9 = pneg %p924_p3 }
  0x3f   : > { %p930_p13 = pnand %p929_p12, %p925_p9 }
  0x8e   : > { %v498_v10 = vpop.permute.xlu2 %497 }
  0x8f   : > { %705 = vmatpush.xpose.msk.msrb.mxu1 %vm323_vm1, %v498_v10 }
  0xa6   : > { %v382_v11 = vpop.permute.xlu0 %381 }
  0xa7   : > { %699 = vmatpush.xpose.msk.msra.mxu2 %vm323_vm1, %v382_v11 }
  0xae   : > { %v440_v12 = vpop.permute.xlu0 %439 }
  0xaf   : > { %702 = vmatpush.xpose.msk.msra.mxu3 %vm323_vm1, %v440_v12 }
  0xb7   : > { %v317_v7 = vpop.f32.mrf.mxu0 }
  0xb8   : > { %v318_v8 = vadd.f32 %v799_v6, %v317_v7 }
  0xba   : > { %320 = vst.msk [vmem:[#allocation2] sm:$0xff] %vm296_vm0, %v318_v8 }
  0xc1   : > { %v491_v9 = vld [vmem:[#allocation2] sm:$0xff] }
  0xc2   : > { %494 = vrot.lane.b32.xlu2 %v491_v9, %s1001_s25  ;;  %378 = vrot.lane.b32.xlu1 %v491_v9, %s1002_s5 }
  0xc3   : > { %698 = vmatmul.msk.f32.vlgmr.msra.gmra.mxu1 %vm323_vm1, %v491_v9 }
  0xca   : > { %436 = vrot.lane.b32.xlu1 %v491_v9, %s1003_s21 }
 0x11c   : > { %v495_v13 = vpop.permute.xlu2 %494 }
 0x11d   : > { %706 = vmatmul.msk.f32.vlgmr.msrb.gmra.mxu1 %vm323_vm1, %v495_v13 }
 0x134   : > { %v379_v14 = vpop.permute.xlu1 %378 }
 0x135   : > { %700 = vmatmul.msk.f32.vlgmr.msra.gmra.mxu2 %vm323_vm1, %v379_v14 }
 0x13c   : > { %v437_v15 = vpop.permute.xlu1 %436 }
 0x13d   : > { %703 = vmatmul.msk.f32.vlgmr.msra.gmra.mxu3 %vm323_vm1, %v437_v15 }
 0x140   : > { %v347_v16 = vpop.f32.mrf.mxu1 }
 0x141   : > { %v350_v17 = vsel %vm323_vm1, %v347_v16, -inf }
 0x142   : > { %351 = vmax.xlane.f32.xlu0 %v350_v17 }
 0x19a   : > { %v520_v27 = vpop.f32.mrf.mxu1 }
 0x19b   : > { %v523_v28 = vsel %vm323_vm1, %v520_v27, -inf }
 0x1b5   : > { %v352_v18 = vpop.xlane.xlu0 %351 }
 0x1b6   : > { %v353_v19 = vsub.f32 %v347_v16, %v352_v18 }
 0x1b8   : > { %v354_v20 = vmul.f32 1.442695, %v353_v19  ;;  %v404_v21 = vpop.f32.mrf.mxu2 }
 0x1b9   : > { %v407_v22 = vsel %vm323_vm1, %v404_v21, -inf }
 0x1ba   : > { %800 = vpow2.f32 %v354_v20  ;;  %408 = vmax.xlane.f32.xlu1 %v407_v22 }
 0x1c0   : > { %v801_v23 = vpop.eup %800  ;;  %v462_v24 = vpop.f32.mrf.mxu3 }
 0x1c1   : > { %v356_v25 = vsel %vm323_vm1, %v801_v23, 0.0  ;;  %v465_v26 = vsel %vm323_vm1, %v462_v24, -inf }
 0x1c2   : > { %357 = vadd.xlane.f32.xlu0 %v356_v25  ;;  %466 = vmax.xlane.f32.xlu2 %v465_v26 }
 0x1ca   : > { %524 = vmax.xlane.f32.xlu2 %v523_v28 }
 0x22d   : > { %v409_v29 = vpop.xlane.xlu1 %408 }
 0x22e   : > { %v410_v30 = vsub.f32 %v404_v21, %v409_v29 }
 0x230   : > { %v411_v31 = vmul.f32 1.442695, %v410_v30 }
 0x232   : > { %802 = vpow2.f32 %v411_v31 }
 0x235   : > { %v358_v32 = vpop.xlane.xlu0 %357  ;;  %v467_v33 = vpop.xlane.xlu2 %466 }
 0x236   : > { %804 = vrcp.f32 %v358_v32  ;;  %v468_v34 = vsub.f32 %v462_v24, %v467_v33  ;;  %v370_v43 = vand.u32 2147483648, %v358_v32  ;;  %v368_v47 = vand.u32 2147483647, %v358_v32 }
 0x237   : > { %vm364_vm3 = vweird.f32 %v358_v32 }
 0x238   : > { %v803_v35 = vpop.eup %802  ;;  %v469_v36 = vmul.f32 1.442695, %v468_v34  ;;  %v371_v50 = vor.u32 1.1754944e-38, %v370_v43  ;;  %vm369_vm5 = vcmp.eq.f32.partialorder %v368_v47, 8.507059e+37 }
 0x239   : > { %v413_v37 = vsel %vm323_vm1, %v803_v35, 0.0 }
 0x23a   : > { %414 = vadd.xlane.f32.xlu1 %v413_v37  ;;  %806 = vpow2.f32 %v469_v36 }
 0x23c   : > { %v805_v38 = vpop.eup %804 }
 0x23d   : > { %v360_v39 = vmul.f32 %v805_v38, %v358_v32  ;;  %v525_v40 = vpop.xlane.xlu2 %524  ;;  %vm365_vm2 = vweird.f32 %v805_v38 }
 0x23e   : > { %v526_v41 = vsub.f32 %v520_v27, %v525_v40  ;;  %vm366_vm4 = vmor %vm364_vm3, %vm365_vm2 }
 0x23f   : > { %v361_v42 = vsub.f32 1.0, %v360_v39 }
 0x240   : > { %v527_v44 = vmul.f32 1.442695, %v526_v41  ;;  %v807_v45 = vpop.eup %806 }
 0x241   : > { %v362_v46 = vmul.f32 %v805_v38, %v361_v42  ;;  %v471_v48 = vsel %vm323_vm1, %v807_v45, 0.0 }
 0x242   : > { %808 = vpow2.f32 %v527_v44  ;;  %472 = vadd.xlane.f32.xlu2 %v471_v48 }
 0x243   : > { %v363_v49 = vadd.f32 %v805_v38, %v362_v46 }
 0x245   : > { %v367_v51 = vsel %vm366_vm4, %v805_v38, %v363_v49 }
 0x246   : > { %v372_v52 = vsel %vm369_vm5, %v371_v50, %v367_v51 }
 0x247   : > { %v373_v53 = vmul.f32 %v801_v23, %v372_v52 }
 0x248   : > { %v1164_v54 = vpop.eup %808 }
 0x249   : > { %374 = vst.msk [vmem:[%s1166_s26] sm:$0xff] %vm323_vm1, %v373_v53  ;;  %v529_v55 = vsel %vm323_vm1, %v1164_v54, 0.0 }
 0x24a   : > { %530 = vadd.xlane.f32.xlu0 %v529_v55 }
 0x2ad   : > { %v415_v56 = vpop.xlane.xlu1 %414 }
 0x2ae   : > { %810 = vrcp.f32 %v415_v56  ;;  %v427_v61 = vand.u32 2147483648, %v415_v56  ;;  %v425_v63 = vand.u32 2147483647, %v415_v56  ;;  %vm421_vm7 = vweird.f32 %v415_v56 }
 0x2b0   : > { %v428_v1 = vor.u32 1.1754944e-38, %v427_v61  ;;  %vm426_vm9 = vcmp.eq.f32.partialorder %v425_v63, 8.507059e+37 }
 0x2b4   : > { %v811_v57 = vpop.eup %810 }
 0x2b5   : > { %v417_v58 = vmul.f32 %v811_v57, %v415_v56  ;;  %v473_v59 = vpop.xlane.xlu2 %472  ;;  %vm422_vm6 = vweird.f32 %v811_v57 }
 0x2b6   : > { %812 = vrcp.f32 %v473_v59  ;;  %vm423_vm8 = vmor %vm421_vm7, %vm422_vm6  ;;  %v485_v9 = vand.u32 2147483648, %v473_v59  ;;  %v483_v11 = vand.u32 2147483647, %v473_v59  ;;  %vm479_vm11 = vweird.f32 %v473_v59 }
 0x2b7   : > { %v418_v60 = vsub.f32 1.0, %v417_v58 }
 0x2b8   : > { %v486_v14 = vor.u32 1.1754944e-38, %v485_v9  ;;  %vm484_vm13 = vcmp.eq.f32.partialorder %v483_v11, 8.507059e+37 }
 0x2b9   : > { %v419_v62 = vmul.f32 %v811_v57, %v418_v60 }
 0x2bb   : > { %v420_v0 = vadd.f32 %v811_v57, %v419_v62 }
 0x2bc   : > { %v813_v2 = vpop.eup %812 }
 0x2bd   : > { %v424_v3 = vsel %vm423_vm8, %v811_v57, %v420_v0  ;;  %v531_v4 = vpop.xlane.xlu0 %530  ;;  %v475_v6 = vmul.f32 %v813_v2, %v473_v59  ;;  %vm480_vm10 = vweird.f32 %v813_v2 }
 0x2be   : > { %v429_v5 = vsel %vm426_vm9, %v428_v1, %v424_v3  ;;  %814 = vrcp.f32 %v531_v4  ;;  %vm481_vm12 = vmor %vm479_vm11, %vm480_vm10  ;;  %v543_v20 = vand.u32 2147483648, %v531_v4  ;;  %v541_v22 = vand.u32 2147483647, %v531_v4 }
 0x2bf   : > { %v430_v7 = vmul.f32 %v803_v35, %v429_v5  ;;  %v476_v8 = vsub.f32 1.0, %v475_v6  ;;  %vm537_vm15 = vweird.f32 %v531_v4 }
 0x2c0   : > { %v544_v24 = vor.u32 1.1754944e-38, %v543_v20  ;;  %vm542_vm2 = vcmp.eq.f32.partialorder %v541_v22, 8.507059e+37 }
 0x2c1   : > { %701 = vst.msk [vmem:[%s1166_s26 + $0x8] sm:$0xff] %vm323_vm1, %v430_v7  ;;  %v477_v10 = vmul.f32 %v813_v2, %v476_v8 }
 0x2c3   : > { %v478_v13 = vadd.f32 %v813_v2, %v477_v10 }
 0x2c4   : > { %v815_v12 = vpop.eup %814 }
 0x2c5   : > { %v533_v15 = vmul.f32 %v815_v12, %v531_v4  ;;  %v482_v16 = vsel %vm481_vm12, %v813_v2, %v478_v13  ;;  %vm538_vm14 = vweird.f32 %v815_v12 }
 0x2c6   : > { %v487_v17 = vsel %vm484_vm13, %v486_v14, %v482_v16  ;;  %vm539_vm0 = vmor %vm537_vm15, %vm538_vm14 }
 0x2c7   : > { %v534_v18 = vsub.f32 1.0, %v533_v15  ;;  %v488_v19 = vmul.f32 %v807_v45, %v487_v17 }
 0x2c9   : > { %v535_v21 = vmul.f32 %v815_v12, %v534_v18  ;;  %704 = vst.msk [vmem:[%s1166_s26 + $0x10] sm:$0xff] %vm323_vm1, %v488_v19 }
 0x2cb   : > { %v536_v23 = vadd.f32 %v815_v12, %v535_v21 }
 0x2cd   : > { %v540_v25 = vsel %vm539_vm0, %v815_v12, %v536_v23 }
 0x2ce   : > { %v545_v26 = vsel %vm542_vm2, %v544_v24, %v540_v25 }
 0x2cf   : > { %v546_v27 = vmul.f32 %v1164_v54, %v545_v26 }
 0x2d1   : > { %707 = vst.msk [vmem:[%s1166_s26 + $0x18] sm:$0xff] %vm323_vm1, %v546_v27 }
 0x2d2   : > { %933 = shalt.err (!%p930_p13)
}
 0x2d3   : > { %s1004_s7 = smov 128   ;;  %s1005_s25 = smov 8  }
 0x2d4   : > { %722 = dma.vmem_to_hbm [thread:$0]  (%p1102_p4), %s564_s18, 512, %s566_s6, %s550_s9, %s1004_s7, %s1004_s7, %s1005_s25  }
 0x2d5 PF: > { %s580_s5 = sand.u32 1, %s976_s15   ;;  %p736_p0 = pnand %p686_p6, %p1110_p7 }
 0x2d6   : > { %s581_s21 = scalar_lea.sflag [#allocation5], %s580_s5 }
 0x2d7   : > { %p737_p2 = pneg %p736_p0 }
 0x2d9   : > { %971 = dma.done.wait (%p737_p2), %s581_s21, 512  }
 0x2da   : > { %973 = vsyncadd (%p737_p2), %s581_s21, 4294966784  ;;  %s23_s20 = sadd.s32 1, %s996_s20   ;;  %s1237_s8 = sld [smem:[#allocation14_spill]] }
 0x2db   : > { %p20_p5 = scmp.ge.s32.totalorder %s23_s20, 4   ;;  %s1238_s17 = sld [smem:[#allocation17_spill]] }
 0x2dc   : > { %s1239_s18 = sld [smem:[#allocation15_spill]]  ;;  %s1241_s15 = smov %s980_s16 }
 0x2dd   : > { %s1240_s19 = sld [smem:[#allocation16_spill]]  ;;  %22 = sbr.rel (!%p20_p5) target bundleno = 10 (0xa), region = 101 }
 0x2e0   : > { %s1242_s16 = smov %s1237_s8 }
 0x2e2   :  { %587 = vsyncpa [#allocation4], 1 }
 0x2e3   :  { %589 = vsyncpa [#allocation4 + $0x1], 1 }
 0x2e4   :  { %590 = vsyncpa [#allocation7], 1 }
 0x2e5   :  { %592 = vsyncpa [#allocation7 + $0x1], 1 }
 0x2e6   :  { %593 = vsyncpa [#allocation5], 1 }
 0x2e7   :  { %595 = vsyncpa [#allocation5 + $0x1], 1 }

</bundles_post_ra>
